<compile_context>
chip_gen: v7x
topology: tpu7x:2x2x1
jax: 0.10.0
libtpu: 0.0.40
codegen_flags: <defaults>
</compile_context>

<pallas_src>
import functools

import jax
import jax.numpy as jnp
from jax.experimental import pallas as pl
from jax.experimental.pallas import tpu as pltpu


def _rezero_linear_kernel(alpha_ref, xk_ref, w_ref, xres_ref, b_ref, o_ref,
                          acc_ref, *, compute_dtype):
    # alpha_ref: SMEM scalar (1,)
    # xk_ref:   [tm, tk]  (LHS slab for this K step)
    # w_ref:    [tk, tn]
    # xres_ref: [tm, tn]  (residual slab, same rows / output columns)
    # b_ref:    [1, tn]
    # o_ref:    [tm, tn]
    # acc_ref:  [tm, tn] f32 scratch accumulator (resident across K steps)
    k = pl.program_id(2)
    nk = pl.num_programs(2)

    @pl.when(k == 0)
    def _():
        acc_ref[...] = jnp.zeros_like(acc_ref)

    a = xk_ref[...]
    w = w_ref[...]
    if compute_dtype is not None:
        a = a.astype(compute_dtype)
        w = w.astype(compute_dtype)
    acc_ref[...] += jnp.dot(a, w, preferred_element_type=jnp.float32)

    # Epilogue: bias + alpha-scaled residual only once, in f32.
    @pl.when(k == nk - 1)
    def _():
        f = acc_ref[...] + b_ref[...].astype(jnp.float32)
        xr = xres_ref[...].astype(jnp.float32)
        o_ref[...] = (xr + alpha_ref[0] * f).astype(o_ref.dtype)


def _round_up(v, m):
    return ((v + m - 1) // m) * m


def _pick_tile(dim_pad, tmax):
    """Largest multiple of 128 <= tmax that divides dim_pad (dim_pad % 128 == 0)."""
    t = (min(tmax, dim_pad) // 128) * 128
    while dim_pad % t != 0:
        t -= 128
    return t


def rezero_linear(x, w, b, alpha, *, tm_max=512, tn_max=256, tk_max=512,
                  compute_dtype=None):
    """ReZero-wrapped Linear: out = x + alpha * (x @ w + b).

    x: [B, S, D]; w: [D_in, D_out] (pre-transposed torch weight); b: [D_out];
    alpha: scalar. compute_dtype=jnp.bfloat16 uses bf16 MXU operands with f32
    accumulation (recommended on v6e/v7x); None keeps the input dtype.
    """
    B, S, D = x.shape
    M = B * S
    x2 = x.reshape(M, D)

    # Pad to lane-dense / sublane-aligned, tileable shapes.
    D_pad = _round_up(D, 128)
    tn = _pick_tile(D_pad, tn_max)
    tk = _pick_tile(D_pad, tk_max)
    tm = min(tm_max, _round_up(M, 8))
    M_pad = _round_up(M, tm)

    if (M_pad, D_pad) != (M, D):
        x2 = jnp.pad(x2, ((0, M_pad - M), (0, D_pad - D)))
    if D_pad != D:
        w2 = jnp.pad(w, ((0, D_pad - D), (0, D_pad - D)))
        b2 = jnp.pad(b, (0, D_pad - D)).reshape(1, D_pad)
    else:
        w2 = w
        b2 = b.reshape(1, D_pad)
    alpha1 = jnp.asarray(alpha, jnp.float32).reshape(1)

    # Grid: j (output cols) outer, i (rows) middle, k (reduction) inner.
    # Weight index_map depends only on (j, k) -> weight tiles reused across
    # all M tiles of a given j.
    grid = (D_pad // tn, M_pad // tm, D_pad // tk)

    kernel = functools.partial(_rezero_linear_kernel,
                               compute_dtype=compute_dtype)

    out = pl.pallas_call(
        kernel,
        out_shape=jax.ShapeDtypeStruct((M_pad, D_pad), x.dtype),
        grid_spec=pltpu.PrefetchScalarGridSpec(
            num_scalar_prefetch=0,
            grid=grid,
            in_specs=[
                pl.BlockSpec(memory_space=pltpu.SMEM),                 # alpha
                pl.BlockSpec((tm, tk), lambda j, i, k: (i, k)),        # x (LHS)
                pl.BlockSpec((tk, tn), lambda j, i, k: (k, j)),        # w
                pl.BlockSpec((tm, tn), lambda j, i, k: (i, j)),        # x (residual)
                pl.BlockSpec((1, tn), lambda j, i, k: (0, j)),         # bias
            ],
            out_specs=pl.BlockSpec((tm, tn), lambda j, i, k: (i, j)),
            scratch_shapes=[pltpu.VMEM((tm, tn), jnp.float32)],
        ),
        compiler_params=pltpu.CompilerParams(
            dimension_semantics=("parallel", "parallel", "arbitrary"),
            vmem_limit_bytes=64 * 1024 * 1024,
        ),
        # NOTE: when the caller doesn't need x afterwards, input_output_aliases
        # could alias the residual x slab to the output to save an HBM buffer.
    )(alpha1, x2, w2, x2, b2)

    if (M_pad, D_pad) != (M, D):
        out = out[:M, :D]
    return out.reshape(B, S, D)


def rezero_linear_ref(x, w, b, alpha):
    f = jnp.einsum("bsd,de->bse", x, w) + b
    return x + alpha * f


if __name__ == "__main__":
    key = jax.random.PRNGKey(0)
    kx, kw, kb, kx2, kw2, kb2 = jax.random.split(key, 6)

    # --- small demo shape, matches the module spec (hidden=32, seq=8, batch=2)
    B, S, D = 2, 8, 32
    x = jax.random.normal(kx, (B, S, D), dtype=jnp.float32)
    # Inner Linear(D, D): torch weight is [D_out, D_in]; store pre-transposed [D_in, D_out].
    w = jax.random.normal(kw, (D, D), dtype=jnp.float32) * 0.1
    b = jax.random.normal(kb, (D,), dtype=jnp.float32) * 0.1

    # ReZero: alpha initialized to 0 exactly as in LayerRZ.__init__.
    alpha0 = jnp.float32(0.0)
    out0 = jax.block_until_ready(rezero_linear(x, w, b, alpha0))
    ref0 = rezero_linear_ref(x, w, b, alpha0)
    assert jnp.allclose(out0, ref0, atol=1e-5, rtol=1e-5)
    assert jnp.allclose(out0, x, atol=1e-5, rtol=1e-5)   # identity at init

    # Trained-alpha path, f32 operands.
    alpha1 = jnp.float32(0.3)
    out1 = jax.block_until_ready(rezero_linear(x, w, b, alpha1))
    ref1 = rezero_linear_ref(x, w, b, alpha1)
    assert jnp.allclose(out1, ref1, atol=1e-4, rtol=1e-4)

    # bf16 MXU operands (f32 accumulation + f32 residual): looser tolerance.
    out1_bf = jax.block_until_ready(
        rezero_linear(x, w, b, alpha1, compute_dtype=jnp.bfloat16))
    assert jnp.allclose(out1_bf, ref1, atol=2e-2, rtol=2e-2)

    # --- moderately larger shape to exercise multi-tile N and K-accumulation
    B2, S2, D2 = 2, 40, 640          # M=80, D_pad=640 -> grid=(5, 1, 5)
    x_l = jax.random.normal(kx2, (B2, S2, D2), dtype=jnp.float32)
    w_l = jax.random.normal(kw2, (D2, D2), dtype=jnp.float32) * 0.05
    b_l = jax.random.normal(kb2, (D2,), dtype=jnp.float32) * 0.1
    out_l = jax.block_until_ready(rezero_linear(x_l, w_l, b_l, alpha1))
    ref_l = rezero_linear_ref(x_l, w_l, b_l, alpha1)
    assert jnp.allclose(out_l, ref_l, atol=1e-3, rtol=1e-3)

    print("KERNEL_OK")
</pallas_src>

<mosaic_0001>
module attributes {stable_mosaic.version = 11 : i64} {
  func.func @_rezero_linear_kernel(%arg0: i32, %arg1: i32, %arg2: i32, %arg3: memref<1xf32, #tpu.memory_space<smem>>, %arg4: memref<16x128xf32, #tpu.memory_space<vmem>>, %arg5: memref<128x128xf32, #tpu.memory_space<vmem>>, %arg6: memref<16x128xf32, #tpu.memory_space<vmem>>, %arg7: memref<1x128xf32, #tpu.memory_space<vmem>>, %arg8: memref<16x128xf32, #tpu.memory_space<vmem>>, %arg9: memref<16x128xf32, #tpu.memory_space<vmem>>) attributes {dimension_semantics = [#tpu.dimension_semantics<parallel>, #tpu.dimension_semantics<parallel>, #tpu.dimension_semantics<arbitrary>], iteration_bounds = array<i64: 1, 1, 1>, scalar_prefetch = 0 : i64, scratch_operands = 1 : i64, tpu.core_type = #tpu.core_type<tc>, window_params = [{transform_indices = @transform_0, window_bounds = array<i64: 1>}, {transform_indices = @transform_1, window_bounds = array<i64: 16, 128>}, {transform_indices = @transform_2, window_bounds = array<i64: 128, 128>}, {transform_indices = @transform_3, window_bounds = array<i64: 16, 128>}, {transform_indices = @transform_4, window_bounds = array<i64: 1, 128>}, {transform_indices = @transform_5, window_bounds = array<i64: 16, 128>}]} {
    %c0_i32 = arith.constant 0 : i32
    %0 = arith.cmpi eq, %arg2, %c0_i32 : i32
    %1 = arith.extui %0 : i1 to i32
    %c0_i32_0 = arith.constant 0 : i32
    %2 = arith.cmpi ne, %1, %c0_i32_0 : i32
    scf.if %2 {
      %cst_10 = arith.constant 0.000000e+00 : f32
      %12 = vector.broadcast %cst_10 : f32 to vector<16x128xf32>
      %c0_11 = arith.constant 0 : index
      %c0_12 = arith.constant 0 : index
      %13 = vector.load %arg9[%c0_11, %c0_12] : memref<16x128xf32, #tpu.memory_space<vmem>>, vector<16x128xf32>
      tpu.vector_store %arg9[%c0_11, %c0_12], %12 {strides = array<i32>} : memref<16x128xf32, #tpu.memory_space<vmem>>, vector<16x128xf32>,
    } else {
    }
    %c0 = arith.constant 0 : index
    %c0_1 = arith.constant 0 : index
    %3 = vector.load %arg4[%c0, %c0_1] : memref<16x128xf32, #tpu.memory_space<vmem>>, vector<16x128xf32>
    %c0_2 = arith.constant 0 : index
    %c0_3 = arith.constant 0 : index
    %4 = vector.load %arg5[%c0_2, %c0_3] : memref<128x128xf32, #tpu.memory_space<vmem>>, vector<128x128xf32>
    %c0_4 = arith.constant 0 : index
    %c0_5 = arith.constant 0 : index
    %5 = vector.load %arg9[%c0_4, %c0_5] : memref<16x128xf32, #tpu.memory_space<vmem>>, vector<16x128xf32>
    %cst = arith.constant dense<0.000000e+00> : vector<16x128xf32>
    %6 = tpu.matmul %3, %4, %cst {dimension_numbers = #tpu.dot_dimension_numbers<[1], [0], [0], [1], [0, 0, 1, 1], [], []>} : vector<16x128xf32>, vector<128x128xf32>, vector<16x128xf32> -> vector<16x128xf32>
    %7 = arith.addf %5, %6 : vector<16x128xf32>
    %c0_6 = arith.constant 0 : index
    %c0_7 = arith.constant 0 : index
    %8 = vector.load %arg9[%c0_6, %c0_7] : memref<16x128xf32, #tpu.memory_space<vmem>>, vector<16x128xf32>
    tpu.vector_store %arg9[%c0_6, %c0_7], %7 {strides = array<i32>} : memref<16x128xf32, #tpu.memory_space<vmem>>, vector<16x128xf32>,
    %c0_i32_8 = arith.constant 0 : i32
    %9 = arith.cmpi eq, %arg2, %c0_i32_8 : i32
    %10 = arith.extui %9 : i1 to i32
    %c0_i32_9 = arith.constant 0 : i32
    %11 = arith.cmpi ne, %10, %c0_i32_9 : i32
    scf.if %11 {
      %c0_10 = arith.constant 0 : index
      %c0_11 = arith.constant 0 : index
      %12 = vector.load %arg9[%c0_10, %c0_11] : memref<16x128xf32, #tpu.memory_space<vmem>>, vector<16x128xf32>
      %c0_12 = arith.constant 0 : index
      %c0_13 = arith.constant 0 : index
      %13 = vector.load %arg7[%c0_12, %c0_13] : memref<1x128xf32, #tpu.memory_space<vmem>>, vector<1x128xf32>
      %14 = vector.broadcast %13 : vector<1x128xf32> to vector<16x128xf32>
      %15 = arith.addf %12, %14 : vector<16x128xf32>
      %c0_14 = arith.constant 0 : index
      %c0_15 = arith.constant 0 : index
      %16 = vector.load %arg6[%c0_14, %c0_15] : memref<16x128xf32, #tpu.memory_space<vmem>>, vector<16x128xf32>
      %c0_16 = arith.constant 0 : index
      %17 = memref.load %arg3[%c0_16] : memref<1xf32, #tpu.memory_space<smem>>
      %18 = vector.broadcast %17 : f32 to vector<16x128xf32>
      %19 = arith.mulf %18, %15 : vector<16x128xf32>
      %20 = arith.addf %16, %19 : vector<16x128xf32>
      %c0_17 = arith.constant 0 : index
      %c0_18 = arith.constant 0 : index
      %21 = vector.load %arg8[%c0_17, %c0_18] : memref<16x128xf32, #tpu.memory_space<vmem>>, vector<16x128xf32>
      tpu.vector_store %arg8[%c0_17, %c0_18], %20 {strides = array<i32>} : memref<16x128xf32, #tpu.memory_space<vmem>>, vector<16x128xf32>,
    } else {
    }
    return
  }
  func.func @transform_0(%arg0: i32, %arg1: i32, %arg2: i32) -> i32 {
    %c0_i32 = arith.constant 0 : i32
    %c0_i32_0 = arith.constant 0 : i32
    return %c0_i32 : i32
  }
  func.func @transform_1(%arg0: i32, %arg1: i32, %arg2: i32) -> (i32, i32) {
    %c0_i32 = arith.constant 0 : i32
    return %arg1, %arg2 : i32, i32
  }
  func.func @transform_2(%arg0: i32, %arg1: i32, %arg2: i32) -> (i32, i32) {
    %c0_i32 = arith.constant 0 : i32
    return %arg2, %arg0 : i32, i32
  }
  func.func @transform_3(%arg0: i32, %arg1: i32, %arg2: i32) -> (i32, i32) {
    %c0_i32 = arith.constant 0 : i32
    return %arg1, %arg0 : i32, i32
  }
  func.func @transform_4(%arg0: i32, %arg1: i32, %arg2: i32) -> (i32, i32) {
    %c0_i32 = arith.constant 0 : i32
    %c0_i32_0 = arith.constant 0 : i32
    return %c0_i32, %arg0 : i32, i32
  }
  func.func @transform_5(%arg0: i32, %arg1: i32, %arg2: i32) -> (i32, i32) {
    %c0_i32 = arith.constant 0 : i32
    return %arg1, %arg0 : i32, i32
  }
}

</mosaic_0001>

<bundles_post_ra>
// kernel: tpu_custom_call.1
= control target key start
LH: loop header
LB: loop body
LE: loop exit
PB: predicated region body
PF: predicated region fallthrough
CT: control target
= control target key end

     0   :  { %11 = vsyncpa [#allocation5], 0  ;;  %s553_s0 = inlined_call_operand.<no memory space> [shape: f32[1], index: 0, kind: input, shape index: {}]   ;;  %s554_s1 = inlined_call_operand.hbm [shape: f32[16,128], index: 1, kind: input, shape index: {}]   ;;  %s555_s2 = inlined_call_operand.hbm [shape: f32[128,128], index: 2, kind: input, shape index: {}]   ;;  %s556_s3 = inlined_call_operand.hbm [shape: f32[16,128], index: 3, kind: input, shape index: {}]   ;;  %s557_s4 = inlined_call_operand.hbm [shape: f32[1,128], index: 4, kind: input, shape index: {}]   ;;  %s558_s5 = inlined_call_operand.hbm [shape: f32[16,128], index: 5, kind: output, shape index: {}]  }
   0x1   :  { %12 = vsyncpa [#allocation8], 0 }
   0x2   :  { %13 = vsyncpa [#allocation11], 0 }
   0x3   :  { %14 = vsyncpa [#allocation6], 0  ;;  %s434_s18 = smov [#allocation7]   ;;  %s435_s20 = smov [#allocation4]  }
   0x4   :  { %s34_s19 = sshll.u32 %s434_s18, 4  ;;  %s22_s21 = sshll.u32 %s435_s20, 4  ;;  %s35_s19 = int_to_ptr.vmem [resolvable:$true] %s34_s19  ;;  %s471_s21 = int_to_ptr.vmem [resolvable:$true] %s22_s21 }
   0x5   :  { %s316_s24 = scalar_lea.hbm %s555_s2, 2048 }
   0x6   :  { %p317_p0 = scmp.ne.s32.totalorder %s555_s2, %s316_s24  ;;  %p320_p1 = scmp.lt.u32.totalorder %s316_s24, %s555_s2 }
   0x8   :  { %p322_p2 = pnand %p320_p1, %p317_p0 }
   0xa   :  { %325 = shalt.err (!%p322_p2)
}
   0xb   :  { %s326_s29 = scalar_lea.vmem %s35_s19, 2048  ;;  %p331_p4 = scmp.lt.s32.totalorder %s35_s19, %s35_s19 }
   0xc   :  { %p327_p3 = scmp.ne.s32.totalorder %s35_s19, %s326_s29  ;;  %p332_p5 = scmp.lt.s32.totalorder %s326_s29, %s326_s29 }
   0xe   :  { %p333_p6 = por %p332_p5, %p331_p4 }
  0x10   :  { %p334_p7 = pnand %p333_p6, %p327_p3 }
  0x12   :  { %337 = shalt.err (!%p334_p7)
}
  0x13   :  { %s436_s30 = smov 128   ;;  %s437_s6 = smov 8  }
  0x14   :  { %40 = dma.hbm_to_vmem [thread:$0]  %s555_s2, 2048, %s35_s19, [#allocation8], %s436_s30, %s436_s30, %s437_s6  }
  0x15   :  { %s338_s11 = scalar_lea.hbm %s554_s1, 256 }
  0x16   :  { %p339_p8 = scmp.ne.s32.totalorder %s554_s1, %s338_s11  ;;  %p342_p9 = scmp.lt.u32.totalorder %s338_s11, %s554_s1 }
  0x18   :  { %p344_p10 = pnand %p342_p9, %p339_p8 }
  0x1a   :  { %347 = shalt.err (!%p344_p10)
}
  0x1b   :  { %s348_s16 = scalar_lea.vmem %s471_s21, 256  ;;  %p353_p12 = scmp.lt.s32.totalorder %s471_s21, %s471_s21 }
  0x1c   :  { %p349_p11 = scmp.ne.s32.totalorder %s471_s21, %s348_s16  ;;  %p354_p13 = scmp.lt.s32.totalorder %s348_s16, %s348_s16 }
  0x1e   :  { %p355_p0 = por %p354_p13, %p353_p12 }
  0x20   :  { %p356_p1 = pnand %p355_p0, %p349_p11 }
  0x22   :  { %359 = shalt.err (!%p356_p1)
}
  0x23   :  { %28 = dma.hbm_to_vmem [thread:$0]  %s554_s1, 256, %s471_s21, [#allocation5], %s436_s30, %s436_s30, %s437_s6  }
  0x24   :  { %s438_s18 = smov [#allocation9]   ;;  %s439_s20 = smov [#allocation10]  }
  0x25   :  { %s46_s19 = sshll.u32 %s438_s18, 4  ;;  %s59_s22 = sshll.u32 %s439_s20, 4  ;;  %s47_s19 = int_to_ptr.vmem [resolvable:$true] %s46_s19  ;;  %s60_s22 = int_to_ptr.vmem [resolvable:$true] %s59_s22 }
  0x26   :  { %s360_s25 = scalar_lea.hbm %s556_s3, 256 }
  0x27   :  { %p361_p2 = scmp.ne.s32.totalorder %s556_s3, %s360_s25  ;;  %p364_p3 = scmp.lt.u32.totalorder %s360_s25, %s556_s3 }
  0x29   :  { %p366_p4 = pnand %p364_p3, %p361_p2 }
  0x2b   :  { %369 = shalt.err (!%p366_p4)
}
  0x2c   :  { %s370_s1 = scalar_lea.vmem %s47_s19, 256  ;;  %p375_p6 = scmp.lt.s32.totalorder %s47_s19, %s47_s19 }
  0x2d   :  { %p371_p5 = scmp.ne.s32.totalorder %s47_s19, %s370_s1  ;;  %p376_p7 = scmp.lt.s32.totalorder %s370_s1, %s370_s1 }
  0x2f   :  { %p377_p8 = por %p376_p7, %p375_p6 }
  0x31   :  { %p378_p9 = pnand %p377_p8, %p371_p5 }
  0x33   :  { %381 = shalt.err (!%p378_p9)
}
  0x34   :  { %52 = dma.hbm_to_vmem [thread:$0]  %s556_s3, 256, %s47_s19, [#allocation8], %s436_s30, %s436_s30, %s437_s6  }
  0x35   :  { %s382_s10 = scalar_lea.hbm %s557_s4, 16 }
  0x36   :  { %p383_p10 = scmp.ne.s32.totalorder %s557_s4, %s382_s10  ;;  %p386_p11 = scmp.lt.u32.totalorder %s382_s10, %s557_s4 }
  0x38   :  { %p388_p12 = pnand %p386_p11, %p383_p10 }
  0x3a   :  { %391 = shalt.err (!%p388_p12)
}
  0x3b   :  { %s392_s15 = scalar_lea.vmem %s60_s22, 16  ;;  %s396_s16 = scalar_lea.vmem %s60_s22, 32 }
  0x3c   :  { %p393_p13 = scmp.ne.s32.totalorder %s60_s22, %s392_s15  ;;  %p397_p0 = scmp.lt.s32.totalorder %s60_s22, %s60_s22 }
  0x3d   :  { %p398_p1 = scmp.lt.s32.totalorder %s396_s16, %s392_s15 }
  0x3f   :  { %p399_p2 = por %p398_p1, %p397_p0 }
  0x41   :  { %p400_p3 = pnand %p399_p2, %p393_p13 }
  0x43   :  { %403 = shalt.err (!%p400_p3)
}
  0x44   :  { %62 = dma.hbm_to_vmem [thread:$0]  %s557_s4, 16, %s60_s22, [#allocation11]  }
  0x45   :  { %426 = dma.done.wait [#allocation5], 256  }
  0x46   :  { %427 = vsyncadd [#allocation5], 4294967040 }
  0x47   :  { %428 = dma.done.wait [#allocation8], 2304  }
  0x48   :  { %429 = vsyncadd [#allocation8], 4294964992 }
  0x49   :  { %430 = dma.done.wait [#allocation11], 16  }
  0x4a   :  { %431 = vsyncadd [#allocation11], 4294967280  ;;  %v83_v0 = vld [vmem:[#allocation7] sm:$0xff]  ;;  %v84_v1 = vld [vmem:[#allocation7 + $0x8] sm:$0xff]  ;;  %v197_v28 = vstv %s553_s0  ;;  %s440_s18 = smov [#allocation12]  }
  0x4b   :  { %v85_v2 = vld [vmem:[#allocation7 + $0x10] sm:$0xff]  ;;  %v277_v3 = vpack.c.bf16 %v84_v1, %v83_v0  ;;  %v86_v4 = vld [vmem:[#allocation7 + $0x18] sm:$0xff]  ;;  %v87_v6 = vld [vmem:[#allocation7 + $0x20] sm:$0xff]  ;;  %s209_s19 = sshll.u32 %s440_s18, 4  ;;  %s210_s19 = int_to_ptr.vmem [resolvable:$true] %s209_s19 }
  0x4c   :  { %v281_v5 = vpack.c.bf16 %v86_v4, %v85_v2  ;;  %v88_v7 = vld [vmem:[#allocation7 + $0x28] sm:$0xff]  ;;  %v81_v9 = vld [vmem:[#allocation4] sm:$0xff]  ;;  %v90_v11 = vld [vmem:[#allocation7 + $0x38] sm:$0xff]  ;;  %s404_s20 = scalar_lea.vmem %s210_s19, 256  ;;  %p409_p5 = scmp.lt.s32.totalorder %s210_s19, %s210_s19 }
  0x4d   :  { %278 = vmatprep.subr.bf16.mxu0 %v277_v3  ;;  %v285_v8 = vpack.c.bf16 %v88_v7, %v87_v6  ;;  %v89_v10 = vld [vmem:[#allocation7 + $0x30] sm:$0xff]  ;;  %274 = vmatprep.mubr.f32.mxu0 %v81_v9  ;;  %v91_v13 = vld [vmem:[#allocation7 + $0x40] sm:$0xff]  ;;  %v92_v14 = vld [vmem:[#allocation7 + $0x48] sm:$0xff]  ;;  %p405_p4 = scmp.ne.s32.totalorder %s210_s19, %s404_s20  ;;  %p410_p6 = scmp.lt.s32.totalorder %s404_s20, %s404_s20 }
  0x4e   :  { %280 = vmatpush3.bf16.msra.mxu0 %v277_v3  ;;  %v289_v12 = vpack.c.bf16 %v90_v11, %v89_v10  ;;  %v293_v15 = vpack.c.bf16 %v92_v14, %v91_v13  ;;  %v93_v16 = vld [vmem:[#allocation7 + $0x50] sm:$0xff]  ;;  %v94_v17 = vld [vmem:[#allocation7 + $0x58] sm:$0xff]  ;;  %v95_v19 = vld [vmem:[#allocation7 + $0x60] sm:$0xff] }
  0x4f   :  { %282 = vmatprep.subr.bf16.mxu0 %v281_v5  ;;  %v297_v18 = vpack.c.bf16 %v94_v17, %v93_v16  ;;  %v96_v20 = vld [vmem:[#allocation7 + $0x68] sm:$0xff]  ;;  %v97_v22 = vld [vmem:[#allocation7 + $0x70] sm:$0xff]  ;;  %v98_v23 = vld [vmem:[#allocation7 + $0x78] sm:$0xff]  ;;  %p411_p7 = por %p410_p6, %p409_p5 }
  0x50   :  { %v301_v21 = vpack.c.bf16 %v96_v20, %v95_v19  ;;  %v305_v24 = vpack.c.bf16 %v98_v23, %v97_v22  ;;  %v82_v25 = vld [vmem:[#allocation4 + $0x8] sm:$0xff]  ;;  %v223_v26 = vld [vmem:[#allocation10] ss:$0 sm:$0xff]  ;;  %v195_v31 = vld [vmem:[#allocation9 + $0x8] sm:$0xff] }
  0x51   :  { %v194_v34 = vld [vmem:[#allocation9] sm:$0xff]  ;;  %p412_p8 = pnand %p411_p7, %p405_p4 }
  0x52   :  { %284 = vmatpush3.bf16.msra.mxu0 %v281_v5 }
  0x53   :  { %286 = vmatprep.subr.bf16.mxu0 %v285_v8 }
  0x56   :  { %288 = vmatpush3.bf16.msra.mxu0 %v285_v8 }
  0x57   :  { %290 = vmatprep.subr.bf16.mxu0 %v289_v12 }
  0x5a   :  { %292 = vmatpush3.bf16.msra.mxu0 %v289_v12 }
  0x5b   :  { %294 = vmatprep.subr.bf16.mxu0 %v293_v15 }
  0x5e   :  { %296 = vmatpush3.bf16.msra.mxu0 %v293_v15 }
  0x5f   :  { %298 = vmatprep.subr.bf16.mxu0 %v297_v18 }
  0x62   :  { %300 = vmatpush3.bf16.msra.mxu0 %v297_v18 }
  0x63   :  { %302 = vmatprep.subr.bf16.mxu0 %v301_v21 }
  0x66   :  { %304 = vmatpush3.bf16.msra.mxu0 %v301_v21 }
  0x67   :  { %306 = vmatprep.subr.bf16.mxu0 %v305_v24 }
  0x6a   :  { %308 = vmatpush3.bf16.msra.mxu0 %v305_v24 }
  0x6d   :  { %275 = vmatmul.mubr.f32.vlgmr.msra.gmra.mrb[0].mxu0 %v82_v25 }
 0x140   :  { %v276_v27 = vpop.f32.mrb[0].mxu0 }
 0x141   :  { %v193_v29 = vadd.f32 %v276_v27, %v223_v26  ;;  %v167_v30 = vpop.f32.mrb[1].mxu0 }
 0x142   :  { %v192_v32 = vadd.f32 %v223_v26, %v167_v30 }
 0x143   :  { %v199_v33 = vmul.f32 %v197_v28, %v193_v29 }
 0x144   :  { %v198_v35 = vmul.f32 %v197_v28, %v192_v32 }
 0x145   :  { %v201_v36 = vadd.f32 %v199_v33, %v195_v31 }
 0x146   :  { %v200_v37 = vadd.f32 %v198_v35, %v194_v34 }
 0x147   :  { %203 = vst [vmem:[#allocation12 + $0x8] sm:$0xff] %v201_v36 }
 0x148   :  { %202 = vst [vmem:[#allocation12] sm:$0xff] %v200_v37 }
 0x149   :  { %415 = shalt.err (!%p412_p8)
}
 0x14a   :  { %s416_s23 = scalar_lea.hbm %s558_s5, 256 }
 0x14b   :  { %p417_p9 = scmp.ne.s32.totalorder %s558_s5, %s416_s23  ;;  %p420_p10 = scmp.lt.u32.totalorder %s416_s23, %s558_s5 }
 0x14d   :  { %p422_p11 = pnand %p420_p10, %p417_p9 }
 0x14f   :  { %425 = shalt.err (!%p422_p11)
}
 0x150   :  { %215 = dma.vmem_to_hbm [thread:$0]  %s210_s19, 256, %s558_s5, [#allocation6], %s436_s30, %s436_s30, %s437_s6  }
 0x151   :  { %432 = dma.done.wait [#allocation6], 256  }
 0x152   :  { %433 = vsyncadd [#allocation6], 4294967040 }
 0x153   :  { %219 = vsyncpa [#allocation5], 1 }
 0x154   :  { %220 = vsyncpa [#allocation8], 1 }
 0x155   :  { %221 = vsyncpa [#allocation11], 1 }
 0x156   :  { %222 = vsyncpa [#allocation6], 1 }

</bundles_post_ra>
